<compile_context>
chip_gen: v5e
topology: v5e:2x2
jax: 0.10.0
libtpu: 0.0.40
codegen_flags: <defaults>
</compile_context>

<pallas_src>
import functools
import math

import jax
import jax.numpy as jnp
from jax.experimental import pallas as pl
from jax.experimental.pallas import tpu as pltpu


_MIN_PALLAS_BYTES = 1 << 20       # below this, plain jnp / XLA fusion wins
_VMEM_LIMIT_BYTES = 48 << 20      # fits v7x's 64 MiB physical VMEM with margin


@functools.cache
def _default_target_block_bytes() -> int:
    """Per-step x-block budget, tuned per TPU generation.

    v7x-class parts (64 MiB VMEM/TC, ~3.2 TB/s HBM): a 4 MiB block is only
    ~2.5 us of traffic, so the ~0.35 us/step pipeline overhead costs >10% of
    roofline -> use 8 MiB.  v5e/v6e (128 MiB VMEM, 0.8-1.4 TB/s HBM): 4 MiB
    blocks already sit at the measured 85-86% roofline plateau.
    """
    try:
        info = pltpu.get_tpu_info()
        vmem_cap = int(getattr(info, "vmem_capacity_bytes", 128 << 20))
        if vmem_cap <= 80 << 20:      # only v7x-class parts have <=64 MiB VMEM
            return 8 << 20
    except Exception:                  # non-TPU query path: safe default
        pass
    return 4 << 20


def _noise_kernel(scale_ref, x_ref, noise_ref, o_ref):
    """o = x + scale * noise, computed in f32, cast to o's dtype.

    scale_ref : (1, rows_pad, 1 or L) f32 -- full array, VMEM-resident
                (constant index_map); sliced per channel block below.
    x_ref/o_ref: (1, TC, TN) blocks of x / out.
    noise_ref : (1, 1, TN) noise block, shared across the channel grid axis.
    """
    tc = x_ref.shape[1]
    if scale_ref.shape[1] == tc:        # single channel block -> no slicing
        s = scale_ref[...]
    else:                               # TC is a multiple of the sublane tile
        start = pl.multiple_of(pl.program_id(2) * tc, 8)
        s = scale_ref[:, pl.ds(start, tc), :]
    x = x_ref[...].astype(jnp.float32)
    n = noise_ref[...].astype(jnp.float32)
    o_ref[...] = (x + s * n).astype(o_ref.dtype)


def noise_block_apply(x, scale, noise, *, use_pallas=None, donate_x=False,
                      target_block_bytes=None):
    """out[b, c, h, w] = x[b, c, h, w] + scale[c] * noise[b or 0, 0, h, w]."""
    B, C, H, W = x.shape
    N = H * W
    Bn = noise.shape[0]
    assert noise.shape[1:] == (1, H, W) and Bn in (1, B)

    itemsize = x.dtype.itemsize
    # Keep scale in f32 (even if x is bf16/fp8); only the final result is cast.
    scale_f32 = scale.reshape(C).astype(jnp.float32)

    if use_pallas is None:
        use_pallas = x.size * itemsize >= _MIN_PALLAS_BYTES
    if not use_pallas:
        # Small inputs (or graphs where NoiseBlock can fuse with an elementwise
        # neighbor): let XLA handle it — saves a full HBM round trip of x.
        out = (x.astype(jnp.float32)
               + scale_f32.reshape(1, C, 1, 1) * noise.astype(jnp.float32))
        return out.astype(x.dtype)

    if target_block_bytes is None:
        target_block_bytes = _default_target_block_bytes()

    # Sublane tile for x's dtype: 8 rows (4-byte), 16 (2-byte), 32 (1-byte).
    sub = max(8, 32 // itemsize)

    # ---- lane-dense layout --------------------------------------------------
    # Normal path: (B, C, N).  If N is not a multiple of 128, fold g channels
    # into the lane axis -> (B, C//g, g*N) so the output last dim is a multiple
    # of 128 (unmasked full-lane stores).
    g = 1
    if N % 128 != 0:
        gg = 128 // math.gcd(N, 128)
        if (C % gg == 0
                and gg * N * sub * itemsize <= max(target_block_bytes, 4 << 20)
                and C * N * 4 <= 8 << 20):   # lane-expanded scale stays small
            g = gg

    if g > 1:
        rows, L = C // g, g * N
        x3 = x.reshape(B, rows, L)
        noise3 = jnp.tile(noise.reshape(Bn, 1, N), (1, 1, g))
        # One f32 scale value per lane within a grouped row.
        scale3 = jnp.repeat(scale_f32, N).reshape(1, rows, L)
    else:
        rows, L = C, N
        x3 = x.reshape(B, rows, L)
        noise3 = noise.reshape(Bn, 1, L)
        scale3 = scale_f32.reshape(1, rows, 1)

    # ---- block sizing: biggest blocks within the per-step budget -------------
    row_bytes = L * itemsize
    if rows * row_bytes <= target_block_bytes or rows <= sub:
        TC = rows
    else:
        TC = int(max(sub, min(rows,
                              (target_block_bytes // row_bytes) // sub * sub)))
    if g > 1 or TC * L * itemsize <= target_block_bytes or L <= 128:
        TN = L       # full lane width (keeps lane-expanded scale resident)
    else:
        TN = int(max(128, (target_block_bytes // (TC * itemsize)) // 128 * 128))

    cb = pl.cdiv(rows, TC)
    nb = pl.cdiv(L, TN)
    grid = (B, nb, cb)   # channel-block axis fastest -> shared noise DMA reused

    # Scale is passed full-size with a constant index_map: DMA'd once, then
    # VMEM-resident.  Pad its channel axis so in-kernel slicing never goes OOB.
    rows_pad = cb * TC
    if rows_pad != rows:
        scale3 = jnp.pad(scale3, ((0, 0), (0, rows_pad - rows), (0, 0)))

    if Bn == B:
        noise_idx = lambda b, n, c: (b, 0, n)
    else:   # single shared noise map broadcast over the batch
        noise_idx = lambda b, n, c: (0, 0, n)

    extra = {}
    if donate_x:
        # x is input #1 (after scale); alias it to the single output.  Only
        # saves an HBM copy if the caller actually donates x under jit.
        extra["input_output_aliases"] = {1: 0}

    out3 = pl.pallas_call(
        _noise_kernel,
        out_shape=jax.ShapeDtypeStruct((B, rows, L), x.dtype),
        grid=grid,
        in_specs=[
            pl.BlockSpec(scale3.shape, lambda b, n, c: (0, 0, 0)),   # resident
            pl.BlockSpec((1, TC, TN), lambda b, n, c: (b, c, n)),    # x
            pl.BlockSpec((1, 1, TN), noise_idx),                     # noise
        ],
        out_specs=pl.BlockSpec((1, TC, TN), lambda b, n, c: (b, c, n)),
        compiler_params=pltpu.CompilerParams(
            # No cross-step dependence anywhere -> all axes parallel, so
            # multi-TensorCore parts (v7x megacore) can split any of them.
            dimension_semantics=("parallel", "parallel", "parallel"),
            vmem_limit_bytes=_VMEM_LIMIT_BYTES),
        **extra,
    )(scale3, x3, noise3)
    return out3.reshape(B, C, H, W)


class NoiseBlock:
    """JAX/Pallas port of the PyTorch NoiseBlock module (forward pass)."""

    def __init__(self, channels: int, resolution: int, mode: str, *, key=None):
        assert mode in ("deterministic", "const-random", "const-deterministic",
                        "random")
        self.mode = mode
        self.resolution = resolution
        self.channels = channels
        # Parameter: scale, initialized to zeros exactly like the PyTorch module.
        self.scale = jnp.zeros((1, channels, 1, 1), dtype=jnp.float32)
        if mode == "deterministic":
            assert key is not None
            # Buffer: fixed noise map, torch.randn(1, 1, R, R) equivalent.
            self.noise = jax.random.normal(
                key, (1, 1, resolution, resolution), dtype=jnp.float32)
        else:
            self.noise = None

    def __call__(self, x, noise=None, *, key=None, use_pallas=None):
        B = x.shape[0]
        if self.mode == "deterministic":
            return noise_block_apply(x, self.scale, self.noise,
                                     use_pallas=use_pallas)
        elif self.mode in ("const-random", "const-deterministic"):
            assert noise is not None
            return noise_block_apply(x, self.scale, noise, use_pallas=use_pallas)
        elif self.mode == "random":
            # TODO(synk): generate the noise in-kernel (pltpu.prng_seed +
            # pltpu.stateful_normal, reseeded per (batch, lane-block) so values
            # are reused across the channel axis) to drop the extra dispatch
            # and the HBM round trip of the noise map.
            assert key is not None
            noise = jax.random.normal(
                key, (B, 1, self.resolution, self.resolution), dtype=jnp.float32)
            return noise_block_apply(x, self.scale, noise, use_pallas=use_pallas)
        else:
            raise AssertionError("unknown mode")


def _reference(x, scale, noise):
    return x + scale * noise


if __name__ == "__main__":
    root = jax.random.PRNGKey(0)
    (k_x, k_buf, k_noise, k_scale, k_x2, k_n2, k_s2,
     k_x3, k_n3, k_s3, k_x4, k_n4, k_s4) = jax.random.split(root, 13)

    # ---------------- module-sized shapes (force the Pallas path) ------------
    B, C, R = 2, 4, 16
    x = jax.random.normal(k_x, (B, C, R, R), dtype=jnp.float32)

    # mode='deterministic' (scale is zeros, as in __init__)
    blk = NoiseBlock(C, R, "deterministic", key=k_buf)
    out_det = jax.block_until_ready(blk(x, use_pallas=True))
    assert jnp.allclose(out_det, _reference(x, blk.scale, blk.noise), atol=1e-6)

    # mode='const-random' with a nonzero scale to exercise the math
    blk2 = NoiseBlock(C, R, "const-random", key=k_buf)
    blk2.scale = jax.random.normal(k_scale, (1, C, 1, 1), dtype=jnp.float32)
    ext_noise = jax.random.normal(k_noise, (B, 1, R, R), dtype=jnp.float32)
    out_cr = jax.block_until_ready(blk2(x, noise=ext_noise, use_pallas=True))
    assert jnp.allclose(out_cr, _reference(x, blk2.scale, ext_noise), atol=1e-5)

    # mode='random' (noise drawn in-wrapper from a JAX key)
    blk3 = NoiseBlock(C, R, "random", key=k_buf)
    blk3.scale = blk2.scale
    out_rnd = jax.block_until_ready(blk3(x, key=k_noise, use_pallas=True))
    ref_rnd = _reference(
        x, blk3.scale, jax.random.normal(k_noise, (B, 1, R, R), jnp.float32))
    assert jnp.allclose(out_rnd, ref_rnd, atol=1e-5)

    # auto mode: tiny input takes the jnp fallback (no kernel launch)
    out_auto = jax.block_until_ready(blk2(x, noise=ext_noise))
    assert jnp.allclose(out_auto, _reference(x, blk2.scale, ext_noise), atol=1e-5)

    # -------- multi-block path: TC < C (padded resident scale), TN < N -------
    B2, C2, R2 = 2, 12, 32
    x2 = jax.random.normal(k_x2, (B2, C2, R2, R2), dtype=jnp.float32)
    s2 = jax.random.normal(k_s2, (1, C2, 1, 1), dtype=jnp.float32)
    n_batched = jax.random.normal(k_n2, (B2, 1, R2, R2), dtype=jnp.float32)
    n_shared = n_batched[:1]

    out_b = jax.block_until_ready(
        noise_block_apply(x2, s2, n_batched, use_pallas=True,
                          target_block_bytes=16 * 1024))
    assert jnp.allclose(out_b, _reference(x2, s2, n_batched), atol=1e-5)

    out_s = jax.block_until_ready(
        noise_block_apply(x2, s2, n_shared, use_pallas=True,
                          target_block_bytes=16 * 1024))
    assert jnp.allclose(out_s, _reference(x2, s2, n_shared), atol=1e-5)

    # -------- small-resolution path: channels folded into the lane axis ------
    B3, C3, R3 = 2, 24, 8            # N = 64 -> g = 2, lane width 128
    x3 = jax.random.normal(k_x3, (B3, C3, R3, R3), dtype=jnp.float32)
    s3 = jax.random.normal(k_s3, (1, C3, 1, 1), dtype=jnp.float32)
    n3 = jax.random.normal(k_n3, (B3, 1, R3, R3), dtype=jnp.float32)
    out_c = jax.block_until_ready(
        noise_block_apply(x3, s3, n3, use_pallas=True, target_block_bytes=2048))
    assert jnp.allclose(out_c, _reference(x3, s3, n3), atol=1e-5)

    # small N that cannot be folded (C not divisible by g): full-N fallback
    x3b = jax.random.normal(k_x3, (4, 5, 8, 8), dtype=jnp.float32)
    s3b = jax.random.normal(k_s3, (1, 5, 1, 1), dtype=jnp.float32)
    n3b = jax.random.normal(k_n3, (4, 1, 8, 8), dtype=jnp.float32)
    out_f = jax.block_until_ready(
        noise_block_apply(x3b, s3b, n3b, use_pallas=True))
    assert jnp.allclose(out_f, _reference(x3b, s3b, n3b), atol=1e-5)

    # -------- bf16 path: dtype-aware (16-row) channel blocking ----------------
    B4, C4, R4 = 2, 48, 32
    x4 = jax.random.normal(k_x4, (B4, C4, R4, R4), dtype=jnp.float32)
    x4_bf = x4.astype(jnp.bfloat16)
    s4 = jax.random.normal(k_s4, (1, C4, 1, 1), dtype=jnp.float32)
    n4 = jax.random.normal(k_n4, (B4, 1, R4, R4), dtype=jnp.float32)
    out_bf = jax.block_until_ready(
        noise_block_apply(x4_bf, s4, n4, use_pallas=True,
                          target_block_bytes=16 * 1024))
    ref_bf = (x4_bf.astype(jnp.float32) + s4 * n4).astype(jnp.bfloat16)
    assert jnp.allclose(out_bf.astype(jnp.float32), ref_bf.astype(jnp.float32),
                        atol=1e-1, rtol=1e-2)

    print("KERNEL_OK")
</pallas_src>

<mosaic_0001>
module attributes {stable_mosaic.version = 11 : i64} {
  func.func @_noise_kernel(%arg0: i32, %arg1: i32, %arg2: i32, %arg3: memref<1x4x1xf32, #tpu.memory_space<vmem>>, %arg4: memref<1x4x256xf32, #tpu.memory_space<vmem>>, %arg5: memref<1x1x256xf32, #tpu.memory_space<vmem>>, %arg6: memref<1x4x256xf32, #tpu.memory_space<vmem>>) attributes {dimension_semantics = [#tpu.dimension_semantics<parallel>, #tpu.dimension_semantics<parallel>, #tpu.dimension_semantics<parallel>], iteration_bounds = array<i64: 2, 1, 1>, scalar_prefetch = 0 : i64, scratch_operands = 0 : i64, tpu.core_type = #tpu.core_type<tc>, window_params = [{pipeline_mode = #tpu.pipeline_mode<synchronous>, transform_indices = @transform_0, window_bounds = array<i64: 1, 4, 1>}, {transform_indices = @transform_1, window_bounds = array<i64: 1, 4, 256>}, {transform_indices = @transform_2, window_bounds = array<i64: 1, 1, 256>}, {transform_indices = @transform_3, window_bounds = array<i64: 1, 4, 256>}]} {
    %c0 = arith.constant 0 : index
    %c0_0 = arith.constant 0 : index
    %c0_1 = arith.constant 0 : index
    %0 = vector.load %arg3[%c0, %c0_0, %c0_1] : memref<1x4x1xf32, #tpu.memory_space<vmem>>, vector<1x4x1xf32>
    %c0_2 = arith.constant 0 : index
    %c0_3 = arith.constant 0 : index
    %c0_4 = arith.constant 0 : index
    %1 = vector.load %arg4[%c0_2, %c0_3, %c0_4] : memref<1x4x256xf32, #tpu.memory_space<vmem>>, vector<1x4x256xf32>
    %c0_5 = arith.constant 0 : index
    %c0_6 = arith.constant 0 : index
    %c0_7 = arith.constant 0 : index
    %2 = vector.load %arg5[%c0_5, %c0_6, %c0_7] : memref<1x1x256xf32, #tpu.memory_space<vmem>>, vector<1x1x256xf32>
    %3 = vector.broadcast %0 : vector<1x4x1xf32> to vector<1x4x256xf32>
    %4 = vector.broadcast %2 : vector<1x1x256xf32> to vector<1x4x256xf32>
    %5 = arith.mulf %3, %4 : vector<1x4x256xf32>
    %6 = arith.addf %1, %5 : vector<1x4x256xf32>
    %c0_8 = arith.constant 0 : index
    %c0_9 = arith.constant 0 : index
    %c0_10 = arith.constant 0 : index
    %7 = vector.load %arg6[%c0_8, %c0_9, %c0_10] : memref<1x4x256xf32, #tpu.memory_space<vmem>>, vector<1x4x256xf32>
    tpu.vector_store %arg6[%c0_8, %c0_9, %c0_10], %6 {strides = array<i32>} : memref<1x4x256xf32, #tpu.memory_space<vmem>>, vector<1x4x256xf32>,
    return
  }
  func.func @transform_0(%arg0: i32, %arg1: i32, %arg2: i32) -> (i32, i32, i32) {
    %c0_i32 = arith.constant 0 : i32
    %c0_i32_0 = arith.constant 0 : i32
    %c0_i32_1 = arith.constant 0 : i32
    %c0_i32_2 = arith.constant 0 : i32
    return %c0_i32, %c0_i32_0, %c0_i32_1 : i32, i32, i32
  }
  func.func @transform_1(%arg0: i32, %arg1: i32, %arg2: i32) -> (i32, i32, i32) {
    %c0_i32 = arith.constant 0 : i32
    return %arg0, %arg2, %arg1 : i32, i32, i32
  }
  func.func @transform_2(%arg0: i32, %arg1: i32, %arg2: i32) -> (i32, i32, i32) {
    %c0_i32 = arith.constant 0 : i32
    %c0_i32_0 = arith.constant 0 : i32
    %c0_i32_1 = arith.constant 0 : i32
    return %c0_i32, %c0_i32_0, %arg1 : i32, i32, i32
  }
  func.func @transform_3(%arg0: i32, %arg1: i32, %arg2: i32) -> (i32, i32, i32) {
    %c0_i32 = arith.constant 0 : i32
    return %arg0, %arg2, %arg1 : i32, i32, i32
  }
}

</mosaic_0001>

<bundles_post_ra>
// kernel: tpu_custom_call.1
= control target key start
LH: loop header
LB: loop body
LE: loop exit
PB: predicated region body
PF: predicated region fallthrough
CT: control target
= control target key end

     0   :  { %8 = vsyncpa [#allocation3], 0  ;;  %s731_s0 = inlined_call_operand.vmem [shape: f32[1,4,1], index: 0, kind: input, shape index: {}]   ;;  %s732_s1 = inlined_call_operand.hbm [shape: f32[2,4,256], index: 1, kind: input, shape index: {}]   ;;  %s733_s2 = inlined_call_operand.vmem [shape: f32[1,1,256], index: 2, kind: input, shape index: {}]   ;;  %s734_s3 = inlined_call_operand.hbm [shape: f32[2,4,256], index: 3, kind: output, shape index: {}]  }
   0x1   :  { %10 = vsyncpa [#allocation3 + $0x1], 0 }
   0x2   :  { %11 = vsyncpa [#allocation4], 0 }
   0x3   :  { %13 = vsyncpa [#allocation4 + $0x1], 0  ;;  %s605_s12 = smov 0   ;;  %s607_s13 = smov 0  }
   0x4   :  { %s609_s14 = smov 0   ;;  %s611_s15 = smov 0  }
   0x5   :  { %s613_s16 = smov 0   ;;  %s615_s17 = smov 0  }
   0x6 LB: > { %s388_s18 = sadd.s32 4294967295, %s582_s17   ;;  %s389_s19 = sadd.s32 4294967294, %s582_s17   ;;  %s582_s17 = sphi %s615_s17, %s19_s17   ;;  %s578_s16 = sphi %s613_s16, %s743_s16   ;;  %s574_s15 = sphi %s611_s15, %s742_s15   ;;  %s570_s14 = sphi %s609_s14, %s741_s14   ;;  %s566_s13 = sphi %s607_s13, %s740_s13   ;;  %s562_s12 = sphi %s605_s12, %s739_s12  }
   0x7   : > { %s38_s20 = sadd.s32 1, %s578_s16  ;;  %s70_s21 = sadd.s32 1, %s570_s14 }
   0x8   : > { %p40_p0 = scmp.ge.s32.totalorder %s38_s20, 2  ;;  %p77_p1 = scmp.ne.s32.totalorder %s570_s14, %s566_s13 }
   0x9   : > { %p78_p2 = scmp.eq.s32.totalorder %s582_s17, 0  ;;  %p83_p3 = scmp.ne.s32.totalorder %s566_s13, %s562_s12 }
   0xa   : > { %s745_s20 = smov (%p40_p0, %s38_s20), 0  ;;  %p84_p5 = scmp.eq.s32.totalorder %s388_s18, 0 }
   0xb   : > { %p646_p4 = por %p78_p2, %p77_p1  ;;  %s63_s23 = ssub.s32 %s578_s16, %s745_s20 }
   0xc   : > { %p137_p6 = scmp.eq.s32.totalorder %s388_s18, 1  ;;  %p68_p7 = scmp.eq.s32.totalorder %s63_s23, 0 }
   0xd   : > { %p652_p8 = por %p84_p5, %p83_p3  ;;  %p143_p10 = scmp.eq.s32.totalorder %s389_s19, 1 }
   0xe   : > { %p656_p9 = por %p137_p6, %p77_p1  ;;  %p392_p12 = scmp.ge.s32.totalorder %s582_s17, 2 }
   0xf   : > { %s661_s26 = scalar_select %p68_p7, %s570_s14, %s70_s21  }
  0x10   : > { %p663_p11 = por %p143_p10, %p83_p3  ;;  %p418_p13 = scmp.lt.s32.totalorder %s582_s17, 2 }
  0x11   : > { %s174_s28 = sand.u32 1, %s570_s14   ;;  %s404_s30 = sshll.u32 %s578_s16, 3 }
  0x12   : > { %s393_s29 = sshll.u32 %s174_s28, 3  ;;  %s187_s6 = scalar_lea.hbm %s732_s1, %s404_s30 }
  0x13   : > { %s178_s7 = scalar_lea.vmem [#allocation2], %s393_s29  ;;  %s189_s9 = sshll.u32 %s187_s6, 4  ;;  %s190_s9 = int_to_ptr.hbm [resolvable:$true] %s189_s9 }
  0x14   : > { %s191_s8 = sshll.u32 %s178_s7, 4  ;;  %p411_p0 = pnand %p418_p13, %p646_p4  ;;  %s192_s8 = int_to_ptr.vmem [resolvable:$true] %s191_s8 }
  0x15   : > { %p396_p1 = scmp.ge.s32.totalorder %s582_s17, 1  ;;  %p196_p2 = scmp.lt.s32.totalorder %s582_s17, 3 }
  0x16   : > { %s175_s10 = scalar_lea.sflag [#allocation3], %s174_s28 }
  0x17   : > { %413 = dma.hbm_to_vmem [thread:$0]  (!%p411_p0), %s190_s9, 128, %s192_s8, %s175_s10  }
  0x18   : > { %p197_p3 = pnand %p396_p1, %p196_p2 }
  0x19   : > { %s679_s11 = sand.u32 (!%p197_p3), 1, %s566_s13  }
  0x1a   : > { %200 = sbr.rel (%p197_p3) target bundleno = 159 (0x9f), region = 32  ;;  %s397_s18 = sshll.u32 (!%p197_p3), %s679_s11, 3 }
  0x1b   : > { %s203_s19 = scalar_lea.sflag (!%p197_p3), [#allocation3], %s679_s11  ;;  %s206_s21 = scalar_lea.vmem (!%p197_p3), [#allocation2], %s397_s18 }
  0x1f   : > { %553 = dma.done.wait (%p652_p8), %s203_s19, 128  }
  0x20   : > { %555 = vsyncadd (%p652_p8), %s203_s19, 4294967168  ;;  %v584_v0 = vmov 0   ;;  %v241_v1 = vld [vmem:[%s731_s0] sm:$0xf]  ;;  %s405_s30 = sshll.u32 %s574_s15, 3  ;;  %vm259_vm0 = vcmask 1043456  }
  0x21   : > { %469 = vset.pattern.permute.xlu0 %v584_v0  ;;  %v243_v2 = vld [vmem:[%s733_s2] sm:$0x3]  ;;  %s280_s5 = scalar_lea.hbm %s734_s3, %s405_s30  ;;  %s233_s6 = scalar_lea.vmem [#allocation5], %s397_s18 }
  0x22   : > { %246 = vperm.xlu0 %469, %v241_v1   ;;  %v251_v3 = vperm.slane %v243_v2, 1  ;;  %v250_v4 = vperm.slane %v243_v2, 0  ;;  %v242_v7 = vld [vmem:[%s206_s21] sm:$0xff]  ;;  %s282_s7 = sshll.u32 %s233_s6, 4  ;;  %s284_s8 = sshll.u32 %s280_s5, 4  ;;  %s283_s7 = int_to_ptr.vmem [resolvable:$true] %s282_s7  ;;  %s285_s8 = int_to_ptr.hbm [resolvable:$true] %s284_s8 }
  0x23   : > { %s265_s15 = scalar_lea.sflag [#allocation4], %s679_s11  ;;  %s514_s9 = sshra.s32 %s285_s8, 4  ;;  %s515_s9 = int_to_ptr.hbm [resolvable:$true] %s514_s9 }
  0x24   : > { %s516_s10 = scalar_lea.hbm %s515_s9, 8  ;;  %s520_s22 = scalar_lea.hbm %s734_s3, 16 }
  0x25   : > { %p517_p4 = scmp.ne.s32.totalorder %s515_s9, %s516_s10  ;;  %p521_p7 = scmp.lt.s32.totalorder %s515_s9, %s734_s3 }
  0x26   : > { %p522_p8 = scmp.lt.s32.totalorder %s520_s22, %s516_s10 }
  0x27   : > { %p518_p5 = pnand %p517_p4, %p656_p9 }
  0x28   : > { %p523_p10 = por %p522_p8, %p521_p7 }
  0x29   : > { %p519_p6 = pneg %p518_p5 }
  0x2b   : > { %p524_p13 = pnand %p523_p10, %p519_p6 }
  0x94   : > { %v247_v5 = vpop.permute.xlu0 %246 }
  0x95   : > { %v255_v6 = vmul.f32 %v251_v3, %v247_v5  ;;  %v254_v8 = vmul.f32 %v250_v4, %v247_v5 }
  0x97   : > { %v258_v9 = vrot.slane %v255_v6, 4 }
  0x99   : > { %v260_v10 = vsel %vm259_vm0, %v254_v8, %v258_v9 }
  0x9a   : > { %v262_v11 = vadd.f32 %v260_v10, %v242_v7 }
  0x9c   : > { %263 = vst [vmem:[%s233_s6] sm:$0xff] %v262_v11 }
  0x9d   : > { %527 = shalt.err (!%p524_p13)
}
  0x9e   : > { %408 = dma.vmem_to_hbm [thread:$0]  (%p656_p9), %s283_s7, 128, %s285_s8, %s265_s15  }
  0x9f PF: > { %s296_s11 = sand.u32 1, %s562_s12   ;;  %p415_p0 = pnand %p392_p12, %p663_p11 }
  0xa0   : > { %s297_s28 = scalar_lea.sflag [#allocation4], %s296_s11 }
  0xa1   : > { %p416_p1 = pneg %p415_p0 }
  0xa3   : > { %557 = dma.done.wait (%p416_p1), %s297_s28, 128  }
  0xa4   : > { %559 = vsyncadd (%p416_p1), %s297_s28, 4294967168  ;;  %s19_s17 = sadd.s32 1, %s582_s17   ;;  %s739_s12 = smov %s566_s13 }
  0xa5   : > { %p16_p2 = scmp.ge.s32.totalorder %s19_s17, 4   ;;  %s740_s13 = smov %s570_s14 }
  0xa6   : > { %s741_s14 = smov %s661_s26  ;;  %s742_s15 = smov %s578_s16 }
  0xa7   : > { %s743_s16 = smov %s745_s20  ;;  %18 = sbr.rel (!%p16_p2) target bundleno = 6 (0x6), region = 80 }
  0xac   :  { %303 = vsyncpa [#allocation3], 1 }
  0xad   :  { %305 = vsyncpa [#allocation3 + $0x1], 1 }
  0xae   :  { %306 = vsyncpa [#allocation4], 1 }
  0xaf   :  { %308 = vsyncpa [#allocation4 + $0x1], 1 }

</bundles_post_ra>
